<compile_context>
chip_gen: v6e
topology: v6e:2x2x1
jax: 0.10.0
libtpu: 0.0.40
codegen_flags: <defaults>
</compile_context>

<pallas_src>
import functools

import jax
import jax.numpy as jnp
from jax.experimental import pallas as pl
from jax.experimental.pallas import tpu as pltpu


_LANE = 128


def _round_up(x, m):
    return ((x + m - 1) // m) * m


def _sublane_multiple(dtype):
    bits = jnp.dtype(dtype).itemsize * 8
    return max(8, 256 // bits)  # 8 for f32, 16 for bf16, 32 for int8/fp8


def _vmem_limit_bytes():
    # Generation-aware scoped-VMEM limit with safe headroom:
    #   v5e/v6e (128 MiB physical) -> 96 MiB, v7x (64 MiB physical) -> 48 MiB.
    cap = 64 << 20  # assume the smallest generation if the query fails
    try:
        info = pltpu.get_tpu_info()
        cap = int(getattr(info, "vmem_capacity_bytes", cap))
    except Exception:
        pass
    return (cap * 3) // 4


def _pick_row_tile(rows, f_pad, itemsize, sublane, vmem_limit):
    # Per-step working set: double-buffered input + output blocks at the I/O
    # dtype, plus ~3 live f32 temporaries (x, d, y) inside the body.
    bytes_per_row = f_pad * (4 * itemsize + 3 * 4)
    budget = (vmem_limit * 6) // 10  # ~60% of the scoped limit
    t = max(sublane, (budget // bytes_per_row) // sublane * sublane)
    t = min(t, 1024)                            # diminishing returns past this
    t = min(t, _round_up(rows, sublane))        # don't tile past the data
    t = max(sublane, (t // sublane) * sublane)
    # Keep the grid a few steps deep (megacore sharding on v7x), but never
    # shrink a step below ~1 MiB of traffic (back into the overhead regime).
    min_step_bytes = 1 << 20
    while (rows // t) < 8 and t > sublane and (t // 2) * f_pad * itemsize >= min_step_bytes:
        t = max(sublane, ((t // 2) // sublane) * sublane)
    return t


def _layernorm_kernel(x_ref, a_ref, b_ref, o_ref, *, eps, n_true):
    # x_ref: (row_tile, F_pad); a_ref/b_ref: (1, F_pad) already f32; o_ref like x_ref.
    x = x_ref[...].astype(jnp.float32)
    row_tile, f_pad = x.shape

    # Padded feature lanes hold zeros, so the sum already covers only the true
    # features; divide by the TRUE count (not the padded width).
    mean = jnp.sum(x, axis=-1, keepdims=True) * jnp.float32(1.0 / n_true)
    d = x - mean

    if n_true == f_pad:
        dm = d
    else:
        lane = jax.lax.broadcasted_iota(jnp.int32, (row_tile, f_pad), 1)
        dm = jnp.where(lane < n_true, d, 0.0)

    # torch.std defaults to the UNBIASED estimator (divide by N-1).
    var = jnp.sum(dm * dm, axis=-1, keepdims=True) * jnp.float32(1.0 / (n_true - 1))
    std = jnp.sqrt(var)

    # Per-row reciprocal (row_tile values) instead of a broadcast divide over
    # row_tile*F elements.  (approx=True is available if a few ulps are OK.)
    inv = pl.reciprocal(std + jnp.float32(eps), approx=False)

    y = (d * inv) * a_ref[...] + b_ref[...]
    o_ref[...] = y.astype(o_ref.dtype)


def layer_norm(x, a_2, b_2, eps=1e-6, row_tile=None, vmem_limit_bytes=None):
    """Matches the torch module: a_2 * (x - mean) / (std + eps) + b_2, unbiased std."""
    orig_shape = x.shape
    features = orig_shape[-1]
    x2d = x.reshape(-1, features)
    rows = x2d.shape[0]

    f_pad = _round_up(features, _LANE)
    sublane = _sublane_multiple(x.dtype)
    if vmem_limit_bytes is None:
        vmem_limit_bytes = _vmem_limit_bytes()
    if row_tile is None:
        row_tile = _pick_row_tile(rows, f_pad, jnp.dtype(x.dtype).itemsize,
                                  sublane, vmem_limit_bytes)
    row_tile = max(sublane, _round_up(row_tile, sublane))
    rows_pad = _round_up(rows, row_tile)

    # Zero-pad to lane-dense features and tile-aligned rows; padding is sliced
    # off after the kernel and never affects the statistics.
    x_p = jnp.pad(x2d, ((0, rows_pad - rows), (0, f_pad - features)))
    a_p = jnp.pad(a_2.astype(jnp.float32).reshape(1, features),
                  ((0, 0), (0, f_pad - features)))
    b_p = jnp.pad(b_2.astype(jnp.float32).reshape(1, features),
                  ((0, 0), (0, f_pad - features)))

    grid = (rows_pad // row_tile,)
    out = pl.pallas_call(
        functools.partial(_layernorm_kernel, eps=float(eps), n_true=features),
        out_shape=jax.ShapeDtypeStruct((rows_pad, f_pad), x.dtype),
        grid_spec=pltpu.PrefetchScalarGridSpec(
            num_scalar_prefetch=0,
            grid=grid,
            in_specs=[
                pl.BlockSpec((row_tile, f_pad), lambda i: (i, 0)),
                pl.BlockSpec((1, f_pad), lambda i: (0, 0)),
                pl.BlockSpec((1, f_pad), lambda i: (0, 0)),
            ],
            out_specs=pl.BlockSpec((row_tile, f_pad), lambda i: (i, 0)),
        ),
        compiler_params=pltpu.CompilerParams(
            dimension_semantics=("parallel",),
            vmem_limit_bytes=int(vmem_limit_bytes),
        ),
    )(x_p, a_p, b_p)

    return out[:rows, :features].reshape(orig_shape)


if __name__ == "__main__":
    key = jax.random.PRNGKey(0)
    batch, seq, hidden = 2, 8, 32

    # Deterministic "module" parameters: a_2 = ones(features), b_2 = zeros(features)
    a_2 = jnp.ones((hidden,), dtype=jnp.float32)
    b_2 = jnp.zeros((hidden,), dtype=jnp.float32)
    eps = 1e-6

    x = jax.random.normal(key, (batch, seq, hidden), dtype=jnp.float32)

    y = layer_norm(x, a_2, b_2, eps=eps)
    y = jax.block_until_ready(y)

    # Reference in plain JAX (unbiased std, eps added to std) for sanity check.
    mean = jnp.mean(x, axis=-1, keepdims=True)
    std = jnp.sqrt(jnp.sum((x - mean) ** 2, axis=-1, keepdims=True) / (hidden - 1))
    y_ref = a_2 * (x - mean) / (std + eps) + b_2
    assert y.shape == x.shape
    assert jnp.allclose(y, y_ref, atol=1e-5, rtol=1e-5), "mismatch vs reference"

    print("KERNEL_OK")
</pallas_src>

<mosaic_0001>
module attributes {stable_mosaic.version = 11 : i64} {
  func.func @_layernorm_kernel(%arg0: i32, %arg1: memref<16x128xf32, #tpu.memory_space<vmem>>, %arg2: memref<1x128xf32, #tpu.memory_space<vmem>>, %arg3: memref<1x128xf32, #tpu.memory_space<vmem>>, %arg4: memref<16x128xf32, #tpu.memory_space<vmem>>) attributes {dimension_semantics = [#tpu.dimension_semantics<parallel>], iteration_bounds = array<i64: 1>, scalar_prefetch = 0 : i64, scratch_operands = 0 : i64, tpu.core_type = #tpu.core_type<tc>, window_params = [{transform_indices = @transform_0, window_bounds = array<i64: 16, 128>}, {pipeline_mode = #tpu.pipeline_mode<synchronous>, transform_indices = @transform_1, window_bounds = array<i64: 1, 128>}, {pipeline_mode = #tpu.pipeline_mode<synchronous>, transform_indices = @transform_2, window_bounds = array<i64: 1, 128>}, {transform_indices = @transform_3, window_bounds = array<i64: 16, 128>}]} {
    %c0 = arith.constant 0 : index
    %c0_0 = arith.constant 0 : index
    %0 = vector.load %arg1[%c0, %c0_0] : memref<16x128xf32, #tpu.memory_space<vmem>>, vector<16x128xf32>
    %cst = arith.constant dense<0.000000e+00> : vector<16xf32>
    %1 = vector.multi_reduction <add>, %0, %cst [1] : vector<16x128xf32> to vector<16xf32>
    %2 = vector.shape_cast %1 : vector<16xf32> to vector<16x1xf32>
    %cst_1 = arith.constant 3.125000e-02 : f32
    %3 = vector.broadcast %cst_1 : f32 to vector<16x1xf32>
    %4 = arith.mulf %2, %3 : vector<16x1xf32>
    %5 = vector.broadcast %4 : vector<16x1xf32> to vector<16x128xf32>
    %6 = arith.subf %0, %5 : vector<16x128xf32>
    %7 = tpu.iota {dimensions = array<i32: 1>} : vector<16x128xi32>
    %c32_i32 = arith.constant 32 : i32
    %8 = vector.broadcast %c32_i32 : i32 to vector<16x128xi32>
    %9 = arith.cmpi slt, %7, %8 : vector<16x128xi32>
    %cst_2 = arith.constant 0.000000e+00 : f32
    %10 = vector.broadcast %cst_2 : f32 to vector<16x128xf32>
    %11 = arith.select %9, %6, %10 : vector<16x128xi1>, vector<16x128xf32>
    %12 = arith.mulf %11, %11 : vector<16x128xf32>
    %cst_3 = arith.constant dense<0.000000e+00> : vector<16xf32>
    %13 = vector.multi_reduction <add>, %12, %cst_3 [1] : vector<16x128xf32> to vector<16xf32>
    %14 = vector.shape_cast %13 : vector<16xf32> to vector<16x1xf32>
    %cst_4 = arith.constant 0.0322580636 : f32
    %15 = vector.broadcast %cst_4 : f32 to vector<16x1xf32>
    %16 = arith.mulf %14, %15 : vector<16x1xf32>
    %17 = math.sqrt %16 : vector<16x1xf32>
    %cst_5 = arith.constant 9.99999997E-7 : f32
    %18 = vector.broadcast %cst_5 : f32 to vector<16x1xf32>
    %19 = arith.addf %17, %18 : vector<16x1xf32>
    %20 = tpu.reciprocal %19 : vector<16x1xf32> -> vector<16x1xf32>
    %21 = vector.broadcast %20 : vector<16x1xf32> to vector<16x128xf32>
    %22 = arith.mulf %6, %21 : vector<16x128xf32>
    %c0_6 = arith.constant 0 : index
    %c0_7 = arith.constant 0 : index
    %23 = vector.load %arg2[%c0_6, %c0_7] : memref<1x128xf32, #tpu.memory_space<vmem>>, vector<1x128xf32>
    %24 = vector.broadcast %23 : vector<1x128xf32> to vector<16x128xf32>
    %25 = arith.mulf %22, %24 : vector<16x128xf32>
    %c0_8 = arith.constant 0 : index
    %c0_9 = arith.constant 0 : index
    %26 = vector.load %arg3[%c0_8, %c0_9] : memref<1x128xf32, #tpu.memory_space<vmem>>, vector<1x128xf32>
    %27 = vector.broadcast %26 : vector<1x128xf32> to vector<16x128xf32>
    %28 = arith.addf %25, %27 : vector<16x128xf32>
    %c0_10 = arith.constant 0 : index
    %c0_11 = arith.constant 0 : index
    %29 = vector.load %arg4[%c0_10, %c0_11] : memref<16x128xf32, #tpu.memory_space<vmem>>, vector<16x128xf32>
    tpu.vector_store %arg4[%c0_10, %c0_11], %28 {strides = array<i32>} : memref<16x128xf32, #tpu.memory_space<vmem>>, vector<16x128xf32>,
    return
  }
  func.func @transform_0(%arg0: i32) -> (i32, i32) {
    %c0_i32 = arith.constant 0 : i32
    %c0_i32_0 = arith.constant 0 : i32
    return %arg0, %c0_i32 : i32, i32
  }
  func.func @transform_1(%arg0: i32) -> (i32, i32) {
    %c0_i32 = arith.constant 0 : i32
    %c0_i32_0 = arith.constant 0 : i32
    %c0_i32_1 = arith.constant 0 : i32
    return %c0_i32, %c0_i32_0 : i32, i32
  }
  func.func @transform_2(%arg0: i32) -> (i32, i32) {
    %c0_i32 = arith.constant 0 : i32
    %c0_i32_0 = arith.constant 0 : i32
    %c0_i32_1 = arith.constant 0 : i32
    return %c0_i32, %c0_i32_0 : i32, i32
  }
  func.func @transform_3(%arg0: i32) -> (i32, i32) {
    %c0_i32 = arith.constant 0 : i32
    %c0_i32_0 = arith.constant 0 : i32
    return %arg0, %c0_i32 : i32, i32
  }
}

</mosaic_0001>

<bundles_post_ra>
// kernel: tpu_custom_call.1
= control target key start
LH: loop header
LB: loop body
LE: loop exit
PB: predicated region body
PF: predicated region fallthrough
CT: control target
= control target key end

     0   :  { %8 = vsyncpa [#allocation3], 0  ;;  %s209_s0 = inlined_call_operand.hbm [shape: f32[16,128], index: 0, kind: input, shape index: {}]   ;;  %s210_s1 = inlined_call_operand.vmem [shape: f32[1,128], index: 1, kind: input, shape index: {}]   ;;  %s211_s2 = inlined_call_operand.vmem [shape: f32[1,128], index: 2, kind: input, shape index: {}]   ;;  %s212_s3 = inlined_call_operand.hbm [shape: f32[16,128], index: 3, kind: output, shape index: {}]  }
   0x1   :  { %9 = vsyncpa [#allocation4], 0  ;;  %s167_s12 = smov [#allocation2]  }
   0x2   :  { %s15_s13 = sshll.u32 %s167_s12, 4  ;;  %s16_s13 = int_to_ptr.vmem [resolvable:$true] %s15_s13 }
   0x3   :  { %s131_s14 = scalar_lea.vmem %s16_s13, 256  ;;  %p136_p1 = scmp.lt.s32.totalorder %s16_s13, %s16_s13 }
   0x4   :  { %p132_p0 = scmp.ne.s32.totalorder %s16_s13, %s131_s14  ;;  %p137_p2 = scmp.lt.s32.totalorder %s131_s14, %s131_s14 }
   0x6   :  { %p138_p3 = por %p137_p2, %p136_p1 }
   0x8   :  { %p139_p4 = pnand %p138_p3, %p132_p0 }
   0xa   :  { %142 = shalt.err (!%p139_p4)
}
   0xb   :  { %s168_s15 = smov 128   ;;  %s169_s16 = smov 8  }
   0xc   :  { %21 = dma.hbm_to_vmem [thread:$0]  %s209_s0, 256, %s16_s13, [#allocation3], %s168_s15, %s168_s15, %s169_s16  }
   0xd   :  { %163 = dma.done.wait [#allocation3], 256  }
   0xe   :  { %164 = vsyncadd [#allocation3], 4294967040  ;;  %v29_v0 = vld [vmem:[#allocation2] sm:$0xff]  ;;  %v30_v1 = vld [vmem:[#allocation2 + $0x8] sm:$0xff]  ;;  %v39_v2 = vlaneseq  ;;  %s170_s22 = smov [#allocation5]  }
   0xf   :  { %31 = vadd.xlane.f32.xlu0 %v29_v0  ;;  %v109_v31 = vld [vmem:[%s210_s1] ss:$0 sm:$0xff]  ;;  %s97_s23 = sshll.u32 %s170_s22, 4  ;;  %s98_s23 = int_to_ptr.vmem [resolvable:$true] %s97_s23 }
  0x10   :  { %v40_v3 = vand.u32 127, %v39_v2  ;;  %v110_v33 = vld [vmem:[%s211_s2] ss:$0 sm:$0xff]  ;;  %s143_s24 = scalar_lea.vmem %s98_s23, 256  ;;  %p148_p6 = scmp.lt.s32.totalorder %s98_s23, %s98_s23 }
  0x11   :  { %p144_p5 = scmp.ne.s32.totalorder %s98_s23, %s143_s24  ;;  %p149_p7 = scmp.lt.s32.totalorder %s143_s24, %s143_s24 }
  0x12   :  { %vm41_vm0 = vcmp.lt.s32.totalorder %v40_v3, 32 }
  0x13   :  { %33 = vadd.xlane.f32.xlu0 %v30_v1  ;;  %p150_p8 = por %p149_p7, %p148_p6 }
  0x15   :  { %p151_p9 = pnand %p150_p8, %p144_p5 }
  0x98   :  { %v32_v4 = vpop.xlane.xlu0 %31 }
  0x99   :  { %v35_v5 = vmul.f32 0.03125, %v32_v4 }
  0x9b   :  { %v37_v6 = vsub.f32 %v29_v0, %v35_v5 }
  0x9c   :  { %v34_v7 = vpop.xlane.xlu0 %33 }
  0x9d   :  { %v36_v8 = vmul.f32 0.03125, %v34_v7  ;;  %v42_v9 = vsel %vm41_vm0, %v37_v6, 0.0 }
  0x9e   :  { %v44_v10 = vmul.f32 %v42_v9, %v42_v9 }
  0x9f   :  { %v38_v11 = vsub.f32 %v30_v1, %v36_v8 }
  0xa0   :  { %46 = vadd.xlane.f32.xlu1 %v44_v10 }
  0xa1   :  { %v43_v12 = vsel %vm41_vm0, %v38_v11, 0.0 }
  0xa2   :  { %v45_v13 = vmul.f32 %v43_v12, %v43_v12 }
  0xa4   :  { %48 = vadd.xlane.f32.xlu1 %v45_v13 }
 0x129   :  { %v47_v14 = vpop.xlane.xlu1 %46 }
 0x12a   :  { %v50_v15 = vmul.f32 0.032258064, %v47_v14 }
 0x12c   :  { %115 = vrsqrt.f32 %v50_v15  ;;  %vm54_vm1 = vcmp.eq.f32.partialorder %v50_v15, inf  ;;  %v57_v20 = vand.u32 2147483648, %v50_v15  ;;  %vm56_vm2 = vcmp.eq.f32.partialorder %v50_v15, 0.0 }
 0x12d   :  { %v49_v16 = vpop.xlane.xlu1 %48 }
 0x12e   :  { %v51_v17 = vmul.f32 0.032258064, %v49_v16 }
 0x130   :  { %117 = vrsqrt.f32 %v51_v17  ;;  %vm61_vm3 = vcmp.eq.f32.partialorder %v51_v17, inf  ;;  %v64_v26 = vand.u32 2147483648, %v51_v17  ;;  %vm63_vm4 = vcmp.eq.f32.partialorder %v51_v17, 0.0 }
 0x139   :  { %v116_v18 = vpop.eup %115 }
 0x13a   :  { %v53_v19 = vmul.f32 %v116_v18, %v50_v15 }
 0x13c   :  { %v55_v21 = vsel %vm54_vm1, %v50_v15, %v53_v19 }
 0x13d   :  { %v118_v22 = vpop.eup %117  ;;  %v58_v23 = vsel %vm56_vm2, %v57_v20, %v55_v21 }
 0x13e   :  { %v66_v24 = vadd.f32 1e-06, %v58_v23  ;;  %v60_v25 = vmul.f32 %v118_v22, %v51_v17 }
 0x140   :  { %119 = vrcp.f32 %v66_v24  ;;  %v62_v27 = vsel %vm61_vm3, %v51_v17, %v60_v25 }
 0x141   :  { %v65_v28 = vsel %vm63_vm4, %v64_v26, %v62_v27 }
 0x142   :  { %v67_v29 = vadd.f32 1e-06, %v65_v28 }
 0x144   :  { %121 = vrcp.f32 %v67_v29 }
 0x14d   :  { %v120_v30 = vpop.eup %119 }
 0x14e   :  { %v70_v32 = vmul.f32 %v120_v30, %v37_v6 }
 0x150   :  { %v79_v34 = vmul.f32 %v109_v31, %v70_v32 }
 0x151   :  { %v122_v35 = vpop.eup %121 }
 0x152   :  { %v71_v36 = vmul.f32 %v122_v35, %v38_v11  ;;  %v88_v37 = vadd.f32 %v110_v33, %v79_v34 }
 0x154   :  { %v80_v38 = vmul.f32 %v109_v31, %v71_v36  ;;  %90 = vst [vmem:[#allocation5] sm:$0xff] %v88_v37 }
 0x156   :  { %v89_v39 = vadd.f32 %v110_v33, %v80_v38 }
 0x158   :  { %91 = vst [vmem:[#allocation5 + $0x8] sm:$0xff] %v89_v39 }
 0x159   :  { %154 = shalt.err (!%p151_p9)
}
 0x15a   :  { %103 = dma.vmem_to_hbm [thread:$0]  %s98_s23, 256, %s212_s3, [#allocation4], %s168_s15, %s168_s15, %s169_s16  }
 0x15b   :  { %165 = dma.done.wait [#allocation4], 256  }
 0x15c   :  { %166 = vsyncadd [#allocation4], 4294967040 }
 0x15d   :  { %107 = vsyncpa [#allocation3], 1 }
 0x15e   :  { %108 = vsyncpa [#allocation4], 1 }

</bundles_post_ra>
